<compile_context>
chip_gen: v7x
topology: tpu7x:2x2x1
jax: 0.10.0
libtpu: 0.0.40
codegen_flags: <defaults>
</compile_context>

<pallas_src>
import jax
import jax.numpy as jnp
from jax import lax
from jax.experimental import pallas as pl
from jax.experimental.pallas import tpu as pltpu


# ----------------------------------------------------------------------------
# Pallas kernel: fused  relu((X @ W) * scale + shift)
# ----------------------------------------------------------------------------
def _deconv_bn_relu_kernel(x_ref, w_ref, scale_ref, shift_ref, o_ref):
    acc = jnp.dot(x_ref[...], w_ref[...], preferred_element_type=jnp.float32)
    o_ref[...] = jnp.maximum(acc * scale_ref[...] + shift_ref[...], 0.0)


def _fused_deconv_bn_relu(xf, wmat, scale, shift, *,
                          matmul_dtype=jnp.bfloat16, max_block_m=1024):
    """relu((xf @ wmat) * scale + shift).

    xf: (M, K)   wmat: (K, N)   scale/shift: (N,)
    Output columns are padded to a lane-dense multiple of 128; M is tiled into
    parallel blocks (megacore-friendly, VMEM-bounded).
    """
    M, K = xf.shape
    K2, N = wmat.shape
    assert K == K2

    # lane-dense output columns
    n_pad = (-N) % 128
    Np = N + n_pad

    # M blocks: at least 2 when possible (megacore), 16-row aligned (bf16
    # sublane packing), capped so x / out tiles stay small in VMEM.
    bm = -(-M // 2) if M >= 32 else M
    bm = min(bm, max_block_m)
    bm = max(16, -(-bm // 16) * 16)
    n_blk = pl.cdiv(M, bm)
    Mp = bm * n_blk

    xp = jnp.pad(xf, ((0, Mp - M), (0, 0))) if Mp != M else xf
    wp = jnp.pad(wmat, ((0, 0), (0, n_pad))) if n_pad else wmat
    sp = jnp.pad(scale, (0, n_pad)) if n_pad else scale
    hp = jnp.pad(shift, (0, n_pad)) if n_pad else shift

    out = pl.pallas_call(
        _deconv_bn_relu_kernel,
        grid=(n_blk,),
        in_specs=[pl.BlockSpec((bm, K), lambda i: (i, 0)),
                  pl.BlockSpec((K, Np), lambda i: (0, 0)),
                  pl.BlockSpec((1, Np), lambda i: (0, 0)),
                  pl.BlockSpec((1, Np), lambda i: (0, 0))],
        out_specs=pl.BlockSpec((bm, Np), lambda i: (i, 0)),
        out_shape=jax.ShapeDtypeStruct((Mp, Np), jnp.float32),
        compiler_params=pltpu.CompilerParams(
            dimension_semantics=("parallel",)),
    )(xp.astype(matmul_dtype), wp.astype(matmul_dtype),
      sp.reshape(1, Np).astype(jnp.float32),
      hp.reshape(1, Np).astype(jnp.float32))

    return out[:M, :N]


# ----------------------------------------------------------------------------
# Module forward (matches PyTorch UpSampler.forward, inference semantics)
# ----------------------------------------------------------------------------
def upsampler_forward(params, x, *, eps=1e-5, matmul_dtype=jnp.bfloat16):
    """x: (B, Cin, H, W) f32 NCHW  ->  (B, Cout, 2H, 2W) f32 NCHW."""
    B, Cin, H, W = x.shape
    w = params['convt_w']                       # torch layout (Cin, Cout, 2, 2)
    Cout = w.shape[1]

    # eval-mode BatchNorm folded to per-channel scale/shift.
    # TODO(synk): training-mode BN (batch statistics) would need an extra
    #             per-channel reduction pass; inference semantics implemented.
    scale = params['bn_gamma'] * lax.rsqrt(params['bn_var'] + eps)
    shift = params['bn_beta'] - params['bn_mean'] * scale

    # ConvTranspose2d(k=2, s=2, bias=False):
    #   out[b, o, 2i+di, 2j+dj] = sum_c x[b, c, i, j] * w[c, o, di, dj]
    xf = x.transpose(0, 2, 3, 1).reshape(B * H * W, Cin)          # NHWC slab
    wmat = w.transpose(0, 2, 3, 1).reshape(Cin, 4 * Cout)         # cols=(di,dj,o)
    y = _fused_deconv_bn_relu(xf, wmat,
                              jnp.tile(scale, 4), jnp.tile(shift, 4),
                              matmul_dtype=matmul_dtype)

    # (B*H*W, 4*Cout) -> NCHW only at the module boundary
    y = y.reshape(B, H, W, 2, 2, Cout).transpose(0, 1, 3, 2, 4, 5)
    return y.reshape(B, 2 * H, 2 * W, Cout).transpose(0, 3, 1, 2)


if __name__ == "__main__":
    B, Cin, Cout, H, W = 2, 64, 32, 16, 16
    key = jax.random.PRNGKey(0)
    k_w, k_x, k_g, k_b, k_m, k_v = jax.random.split(key, 6)

    params = dict(
        convt_w=0.05 * jax.random.normal(k_w, (Cin, Cout, 2, 2), jnp.float32),
        bn_gamma=1.0 + 0.1 * jax.random.normal(k_g, (Cout,), jnp.float32),
        bn_beta=0.05 * jax.random.normal(k_b, (Cout,), jnp.float32),
        bn_mean=0.02 * jax.random.normal(k_m, (Cout,), jnp.float32),
        bn_var=1.0 + 0.1 * jnp.abs(jax.random.normal(k_v, (Cout,), jnp.float32)),
    )
    x = jax.random.normal(k_x, (B, Cin, H, W), jnp.float32)

    fwd = jax.jit(upsampler_forward)
    out = jax.block_until_ready(fwd(params, x))

    # plain-JAX f32 reference (ConvTranspose2d k=2 s=2 + eval BN + ReLU)
    t = jnp.einsum('bcij,codk->boidjk', x, params['convt_w'])
    t = t.reshape(B, Cout, 2 * H, 2 * W)
    ref_scale = params['bn_gamma'] / jnp.sqrt(params['bn_var'] + 1e-5)
    ref_shift = params['bn_beta'] - params['bn_mean'] * ref_scale
    ref = jnp.maximum(t * ref_scale[None, :, None, None]
                      + ref_shift[None, :, None, None], 0.0)

    assert out.shape == (B, Cout, 2 * H, 2 * W) and out.dtype == jnp.float32
    assert jnp.allclose(out, ref, atol=5e-2, rtol=5e-2), \
        float(jnp.max(jnp.abs(out - ref)))
    print("KERNEL_OK")
</pallas_src>

<mosaic_0001>
module attributes {stable_mosaic.version = 11 : i64} {
  func.func @_deconv_bn_relu_kernel(%arg0: i32, %arg1: memref<256x64xbf16, #tpu.memory_space<vmem>>, %arg2: memref<64x128xbf16, #tpu.memory_space<vmem>>, %arg3: memref<1x128xf32, #tpu.memory_space<vmem>>, %arg4: memref<1x128xf32, #tpu.memory_space<vmem>>, %arg5: memref<256x128xf32, #tpu.memory_space<vmem>>) attributes {dimension_semantics = [#tpu.dimension_semantics<parallel>], iteration_bounds = array<i64: 2>, scalar_prefetch = 0 : i64, scratch_operands = 0 : i64, tpu.core_type = #tpu.core_type<tc>, window_params = [{transform_indices = @transform_0, window_bounds = array<i64: 256, 64>}, {pipeline_mode = #tpu.pipeline_mode<synchronous>, transform_indices = @transform_1, window_bounds = array<i64: 64, 128>}, {pipeline_mode = #tpu.pipeline_mode<synchronous>, transform_indices = @transform_2, window_bounds = array<i64: 1, 128>}, {pipeline_mode = #tpu.pipeline_mode<synchronous>, transform_indices = @transform_3, window_bounds = array<i64: 1, 128>}, {transform_indices = @transform_4, window_bounds = array<i64: 256, 128>}]} {
    %c0 = arith.constant 0 : index
    %c0_0 = arith.constant 0 : index
    %0 = vector.load %arg1[%c0, %c0_0] : memref<256x64xbf16, #tpu.memory_space<vmem>>, vector<256x64xbf16>
    %c0_1 = arith.constant 0 : index
    %c0_2 = arith.constant 0 : index
    %1 = vector.load %arg2[%c0_1, %c0_2] : memref<64x128xbf16, #tpu.memory_space<vmem>>, vector<64x128xbf16>
    %cst = arith.constant dense<0.000000e+00> : vector<256x128xf32>
    %2 = tpu.matmul %0, %1, %cst {dimension_numbers = #tpu.dot_dimension_numbers<[1], [0], [0], [1], [0, 0, 1, 1], [], []>} : vector<256x64xbf16>, vector<64x128xbf16>, vector<256x128xf32> -> vector<256x128xf32>
    %c0_3 = arith.constant 0 : index
    %c0_4 = arith.constant 0 : index
    %3 = vector.load %arg3[%c0_3, %c0_4] : memref<1x128xf32, #tpu.memory_space<vmem>>, vector<1x128xf32>
    %4 = vector.broadcast %3 : vector<1x128xf32> to vector<256x128xf32>
    %5 = arith.mulf %2, %4 : vector<256x128xf32>
    %c0_5 = arith.constant 0 : index
    %c0_6 = arith.constant 0 : index
    %6 = vector.load %arg4[%c0_5, %c0_6] : memref<1x128xf32, #tpu.memory_space<vmem>>, vector<1x128xf32>
    %7 = vector.broadcast %6 : vector<1x128xf32> to vector<256x128xf32>
    %8 = arith.addf %5, %7 : vector<256x128xf32>
    %cst_7 = arith.constant 0.000000e+00 : f32
    %9 = vector.broadcast %cst_7 : f32 to vector<256x128xf32>
    %10 = arith.maximumf %8, %9 : vector<256x128xf32>
    %c0_8 = arith.constant 0 : index
    %c0_9 = arith.constant 0 : index
    %11 = vector.load %arg5[%c0_8, %c0_9] : memref<256x128xf32, #tpu.memory_space<vmem>>, vector<256x128xf32>
    tpu.vector_store %arg5[%c0_8, %c0_9], %10 {strides = array<i32>} : memref<256x128xf32, #tpu.memory_space<vmem>>, vector<256x128xf32>,
    return
  }
  func.func @transform_0(%arg0: i32) -> (i32, i32) {
    %c0_i32 = arith.constant 0 : i32
    %c0_i32_0 = arith.constant 0 : i32
    return %arg0, %c0_i32 : i32, i32
  }
  func.func @transform_1(%arg0: i32) -> (i32, i32) {
    %c0_i32 = arith.constant 0 : i32
    %c0_i32_0 = arith.constant 0 : i32
    %c0_i32_1 = arith.constant 0 : i32
    return %c0_i32, %c0_i32_0 : i32, i32
  }
  func.func @transform_2(%arg0: i32) -> (i32, i32) {
    %c0_i32 = arith.constant 0 : i32
    %c0_i32_0 = arith.constant 0 : i32
    %c0_i32_1 = arith.constant 0 : i32
    return %c0_i32, %c0_i32_0 : i32, i32
  }
  func.func @transform_3(%arg0: i32) -> (i32, i32) {
    %c0_i32 = arith.constant 0 : i32
    %c0_i32_0 = arith.constant 0 : i32
    %c0_i32_1 = arith.constant 0 : i32
    return %c0_i32, %c0_i32_0 : i32, i32
  }
  func.func @transform_4(%arg0: i32) -> (i32, i32) {
    %c0_i32 = arith.constant 0 : i32
    %c0_i32_0 = arith.constant 0 : i32
    return %arg0, %c0_i32 : i32, i32
  }
}

</mosaic_0001>

<bundles_post_ra>
// kernel: tile.17
= control target key start
LH: loop header
LB: loop body
LE: loop exit
PB: predicated region body
PF: predicated region fallthrough
CT: control target
= control target key end

     0   :  { %s22_s0 = inlined_call_operand.vmem [shape: f32[32], index: 0, kind: input, shape index: {}]   ;;  %s23_s1 = inlined_call_operand.vmem [shape: f32[4,32], index: 1, kind: output, shape index: {}]  }
   0x1   :  { %v4_v0 = vld [vmem:[%s22_s0] ss:$0 sm:$0xff] }
   0x2   :  { %5 = vst [vmem:[%s23_s1] sm:$0xf] %v4_v0 }

// kernel: tile.19
= control target key start
LH: loop header
LB: loop body
LE: loop exit
PB: predicated region body
PF: predicated region fallthrough
CT: control target
= control target key end

     0   :  { %vm7_vm0 = vcmask 261120   ;;  %s37_s8 = smov 32   ;;  %s38_s9 = smov 64   ;;  %vm13_vm1 = vcmask 1048320   ;;  %vm19_vm2 = vcmask 785920   ;;  %vm25_vm3 = vcmask 523520   ;;  %s55_s0 = inlined_call_operand.vmem [shape: f32[4,32], index: 0, kind: input, shape index: {}]   ;;  %s56_s1 = inlined_call_operand.vmem [shape: f32[1,128], index: 1, kind: output, shape index: {}]  }
   0x1   :  { %v4_v0 = vld [vmem:[%s55_s0] sm:$0xf]  ;;  %s36_s0 = smov 96  }
   0x2   :  { %5 = vst [vmem:[#allocation1] sm:$0xf] %v4_v0 }
   0x9   :  { %v10_v1 = vld [vmem:[#allocation1 + $0x3] sm:$0x1]   ;;  %v22_v2 = vld [vmem:[#allocation1 + $0x1] sm:$0x1]   ;;  %v6_v3 = vld [vmem:[#allocation1] sm:$0x1]  }
   0xa   :  { %11 = vrot.lane.b32.xlu0 %v10_v1, %s36_s0  ;;  %23 = vrot.lane.b32.xlu1 %v22_v2, %s37_s8  ;;  %v16_v4 = vld [vmem:[#allocation1 + $0x2] sm:$0x1]   ;;  %8 = vst.msk [vmem:[#allocation0] sm:$0x1] %vm7_vm0, %v6_v3  }
   0xe   :  { %17 = vrot.lane.b32.xlu0 %v16_v4, %s38_s9 }
  0x7c   :  { %v12_v5 = vpop.permute.xlu0 %11   ;;  %v24_v6 = vpop.permute.xlu1 %23  }
  0x7d   :  { %14 = vst.msk [vmem:[#allocation0] sm:$0x1] %vm13_vm1, %v12_v5  }
  0x80   :  { %v18_v7 = vpop.permute.xlu0 %17  }
  0x81   :  { %20 = vst.msk [vmem:[#allocation0] sm:$0x1] %vm19_vm2, %v18_v7  }
  0x82   :  { %26 = vst.msk [vmem:[#allocation0] sm:$0x1] %vm25_vm3, %v24_v6  }
  0x89   :  { %v30_v8 = vld [vmem:[#allocation0] sm:$0x1] }
  0x8a   :  { %32 = vst [vmem:[%s56_s1] sm:$0x1] %v30_v8 }

// kernel: upsampler_forward.1
= control target key start
LH: loop header
LB: loop body
LE: loop exit
PB: predicated region body
PF: predicated region fallthrough
CT: control target
= control target key end

     0   :  { %s932_s15 = smov 0   ;;  %s1107_s0 = inlined_call_operand.vmem [shape: bf16[512,64], index: 0, kind: input, shape index: {}]   ;;  %s1108_s1 = inlined_call_operand.vmem [shape: bf16[64,128], index: 1, kind: input, shape index: {}]   ;;  %s1109_s2 = inlined_call_operand.vmem [shape: f32[1,128], index: 2, kind: input, shape index: {}]   ;;  %s1110_s3 = inlined_call_operand.vmem [shape: f32[1,128], index: 3, kind: input, shape index: {}]   ;;  %s1111_s4 = inlined_call_operand.vmem [shape: f32[512,128], index: 4, kind: output, shape index: {}]  }
   0x1 LB: > { %s754_s16 = sadd.s32 4294967295, %s905_s15   ;;  %p758_p0 = scmp.ge.s32.totalorder %s905_s15, 1  ;;  %s905_s15 = sphi %s932_s15, %s14_s15  }
   0x2   : > { %p163_p1 = scmp.lt.s32.totalorder %s905_s15, 3 }
   0x4   : > { %p164_p2 = pnand %p758_p0, %p163_p1 }
   0x5   : > { %v879_v0 = vld [vmem:[%s1108_s1] sm:$0xff] (!%p164_p2)   ;;  %s759_s19 = sshll.u32 (!%p164_p2), %s754_s16, 5  ;;  %v880_v1 = vld [vmem:[%s1108_s1 + $0x8] sm:$0xff] (!%p164_p2)   ;;  %v881_v2 = vld [vmem:[%s1108_s1 + $0x10] sm:$0xff] (!%p164_p2)   ;;  %vm346_vm0 = vcmask (!%p164_p2), 523264  }
   0x6   : > { %167 = sbr.rel (%p164_p2) target bundleno = 268 (0x10c), region = 36  ;;  %p190_p3 = scmp.lt.s32.totalorder (!%p164_p2), %s759_s19, 63  ;;  %823 = vmatprep.subr.bf16.mxu0 (!%p164_p2), %v879_v0  ;;  %863 = vmatprep.subr.bf16.mxu1 (!%p164_p2), %v879_v0  ;;  %v882_v3 = vld [vmem:[%s1108_s1 + $0x18] sm:$0xff] (!%p164_p2)   ;;  %v995_v20 = vld [vmem:[%s1109_s2] ss:$0 sm:$0xff] (!%p164_p2) }
   0x7   : > { %824 = vmatpush3.bf16.msra.mxu0 (!%p164_p2), %v879_v0  ;;  %867 = vmatpush3.bf16.msra.mxu1 (!%p164_p2), %v879_v0  ;;  %v1000_v22 = vld [vmem:[%s1110_s3] ss:$0 sm:$0xff] (!%p164_p2) }
   0x8   : > { %825 = vmatprep.subr.bf16.mxu0 (!%p164_p2), %v880_v1  ;;  %864 = vmatprep.subr.bf16.mxu1 (!%p164_p2), %v880_v1 }
   0xb   : > { %826 = vmatpush3.bf16.msra.mxu0 (!%p164_p2), %v880_v1  ;;  %868 = vmatpush3.bf16.msra.mxu1 (!%p164_p2), %v880_v1 }
   0xc   : > { %827 = vmatprep.subr.bf16.mxu0 (!%p164_p2), %v881_v2  ;;  %865 = vmatprep.subr.bf16.mxu1 (!%p164_p2), %v881_v2 }
   0xd   : > { %s1113_s19 = smov (!%p190_p3, %s759_s19), 63 }
   0xe   : > { %s760_s24 = sshll.u32 %s1113_s19, 2  ;;  %s762_s8 = sshll.u32 %s1113_s19, 3 }
   0xf   : > { %s958_s29 = scalar_lea.vmem %s1107_s0, %s760_s24  ;;  %828 = vmatpush3.bf16.msra.mxu0 %v881_v2  ;;  %869 = vmatpush3.bf16.msra.mxu1 %v881_v2  ;;  %s1014_s11 = scalar_lea.vmem %s1111_s4, %s762_s8 }
  0x10   : > { %v883_v4 = vld [vmem:[%s958_s29] sm:$0xff]   ;;  %829 = vmatprep.subr.bf16.mxu0 %v882_v3  ;;  %866 = vmatprep.subr.bf16.mxu1 %v882_v3  ;;  %v885_v6 = vld [vmem:[%s958_s29 + $0x8] sm:$0xff]   ;;  %v887_v8 = vld [vmem:[%s958_s29 + $0x10] sm:$0xff]  }
  0x11   : > { %v884_v5 = vld [vmem:[%s958_s29 + $0x40] sm:$0xff]   ;;  %831 = vmatprep.mubr.msk.bf16.mxu0 %vm346_vm0, %v883_v4  ;;  %v886_v7 = vld [vmem:[%s958_s29 + $0x48] sm:$0xff]   ;;  %v888_v9 = vld [vmem:[%s958_s29 + $0x50] sm:$0xff]  }
  0x12   : > { %847 = vmatprep.mubr.msk.bf16.mxu1 %vm346_vm0, %v884_v5  ;;  %v889_v10 = vld [vmem:[%s958_s29 + $0x18] sm:$0xff]   ;;  %v891_v12 = vld [vmem:[%s958_s29 + $0x20] sm:$0xff]   ;;  %v893_v14 = vld [vmem:[%s958_s29 + $0x28] sm:$0xff]  }
  0x13   : > { %830 = vmatpush3.bf16.msra.mxu0 %v882_v3  ;;  %870 = vmatpush3.bf16.msra.mxu1 %v882_v3  ;;  %v890_v11 = vld [vmem:[%s958_s29 + $0x58] sm:$0xff]   ;;  %v892_v13 = vld [vmem:[%s958_s29 + $0x60] sm:$0xff]   ;;  %v894_v15 = vld [vmem:[%s958_s29 + $0x68] sm:$0xff]  }
  0x14   : > { %v895_v16 = vld [vmem:[%s958_s29 + $0x30] sm:$0xff]   ;;  %v897_v18 = vld [vmem:[%s958_s29 + $0x38] sm:$0xff]  }
  0x15   : > { %v896_v17 = vld [vmem:[%s958_s29 + $0x70] sm:$0xff]   ;;  %v898_v19 = vld [vmem:[%s958_s29 + $0x78] sm:$0xff]  }
  0x16   : > { %832 = vmatmul.mubr.msk.bf16.vlgmr.msra.gmra.mrb[0].mxu0 %vm346_vm0, %v885_v6  ;;  %848 = vmatmul.mubr.msk.bf16.vlgmr.msra.gmra.mrb[0].mxu1 %vm346_vm0, %v886_v7 }
  0x17   : > { %835 = vmatprep.mubr.msk.bf16.mxu0 %vm346_vm0, %v887_v8  ;;  %851 = vmatprep.mubr.msk.bf16.mxu1 %vm346_vm0, %v888_v9 }
  0x1e   : > { %836 = vmatmul.mubr.msk.bf16.gmra.mrb[4].mxu0 %vm346_vm0, %v889_v10  ;;  %852 = vmatmul.mubr.msk.bf16.gmra.mrb[4].mxu1 %vm346_vm0, %v890_v11 }
  0x1f   : > { %839 = vmatprep.mubr.msk.bf16.mxu0 %vm346_vm0, %v891_v12  ;;  %855 = vmatprep.mubr.msk.bf16.mxu1 %vm346_vm0, %v892_v13 }
  0x26   : > { %840 = vmatmul.mubr.msk.bf16.gmra.mrb[8].mxu0 %vm346_vm0, %v893_v14  ;;  %856 = vmatmul.mubr.msk.bf16.gmra.mrb[8].mxu1 %vm346_vm0, %v894_v15 }
  0x27   : > { %843 = vmatprep.mubr.msk.bf16.mxu0 %vm346_vm0, %v895_v16  ;;  %859 = vmatprep.mubr.msk.bf16.mxu1 %vm346_vm0, %v896_v17 }
  0x2e   : > { %844 = vmatmul.mubr.msk.bf16.gmra.mrb[12].mxu0 %vm346_vm0, %v897_v18  ;;  %860 = vmatmul.mubr.msk.bf16.gmra.mrb[12].mxu1 %vm346_vm0, %v898_v19 }
  0xe9   : > { %v833_v21 = vpop.f32.mrb[0].mxu0  ;;  %v849_v23 = vpop.f32.mrb[0].mxu1 }
  0xea   : > { %v565_v24 = vmul.f32 %v833_v21, %v995_v20  ;;  %v581_v25 = vmul.f32 %v849_v23, %v995_v20  ;;  %v429_v26 = vpop.f32.mrb[1].mxu0  ;;  %v493_v27 = vpop.f32.mrb[1].mxu1 }
  0xeb   : > { %v563_v28 = vmul.f32 %v995_v20, %v429_v26  ;;  %v579_v29 = vmul.f32 %v995_v20, %v493_v27  ;;  %v834_v30 = vpop.f32.mrb[2].mxu0  ;;  %v850_v31 = vpop.f32.mrb[2].mxu1 }
  0xec   : > { %v604_v32 = vadd.f32 %v1000_v22, %v565_v24  ;;  %v620_v33 = vadd.f32 %v1000_v22, %v581_v25  ;;  %v566_v34 = vmul.f32 %v834_v30, %v995_v20  ;;  %v582_v35 = vmul.f32 %v850_v31, %v995_v20  ;;  %v432_v36 = vpop.f32.mrb[3].mxu0  ;;  %v496_v37 = vpop.f32.mrb[3].mxu1 }
  0xed   : > { %v602_v38 = vadd.f32 %v1000_v22, %v563_v28  ;;  %v618_v39 = vadd.f32 %v1000_v22, %v579_v29  ;;  %v564_v40 = vmul.f32 %v995_v20, %v432_v36  ;;  %v580_v41 = vmul.f32 %v995_v20, %v496_v37 }
  0xee   : > { %v636_v42 = vmax.f32 %v604_v32, 0.0  ;;  %v652_v43 = vmax.f32 %v620_v33, 0.0  ;;  %v605_v44 = vadd.f32 %v1000_v22, %v566_v34  ;;  %v621_v45 = vadd.f32 %v1000_v22, %v582_v35 }
  0xef   : > { %v634_v46 = vmax.f32 %v602_v38, 0.0  ;;  %v650_v47 = vmax.f32 %v618_v39, 0.0  ;;  %v603_v48 = vadd.f32 %v1000_v22, %v564_v40  ;;  %v619_v49 = vadd.f32 %v1000_v22, %v580_v41 }
  0xf0   : > { %668 = vst [vmem:[%s1014_s11 + $0x10] sm:$0xff] %v636_v42  ;;  %684 = vst [vmem:[%s1014_s11 + $0x90] sm:$0xff] %v652_v43  ;;  %v637_v50 = vmax.f32 %v605_v44, 0.0  ;;  %v653_v51 = vmax.f32 %v621_v45, 0.0 }
  0xf1   : > { %666 = vst [vmem:[%s1014_s11] sm:$0xff] %v634_v46  ;;  %682 = vst [vmem:[%s1014_s11 + $0x80] sm:$0xff] %v650_v47  ;;  %v635_v52 = vmax.f32 %v603_v48, 0.0  ;;  %v651_v53 = vmax.f32 %v619_v49, 0.0  ;;  %v837_v54 = vpop.f32.mrb[4].mxu0  ;;  %v853_v55 = vpop.f32.mrb[4].mxu1 }
  0xf2   : > { %669 = vst [vmem:[%s1014_s11 + $0x18] sm:$0xff] %v637_v50  ;;  %685 = vst [vmem:[%s1014_s11 + $0x98] sm:$0xff] %v653_v51  ;;  %v569_v56 = vmul.f32 %v837_v54, %v995_v20  ;;  %v585_v57 = vmul.f32 %v853_v55, %v995_v20  ;;  %v445_v58 = vpop.f32.mrb[5].mxu0  ;;  %v509_v59 = vpop.f32.mrb[5].mxu1 }
  0xf3   : > { %667 = vst [vmem:[%s1014_s11 + $0x8] sm:$0xff] %v635_v52  ;;  %683 = vst [vmem:[%s1014_s11 + $0x88] sm:$0xff] %v651_v53  ;;  %v567_v60 = vmul.f32 %v995_v20, %v445_v58  ;;  %v583_v61 = vmul.f32 %v995_v20, %v509_v59  ;;  %v838_v62 = vpop.f32.mrb[6].mxu0  ;;  %v854_v63 = vpop.f32.mrb[6].mxu1 }
  0xf4   : > { %v608_v0 = vadd.f32 %v1000_v22, %v569_v56  ;;  %v624_v1 = vadd.f32 %v1000_v22, %v585_v57  ;;  %v570_v2 = vmul.f32 %v838_v62, %v995_v20  ;;  %v586_v3 = vmul.f32 %v854_v63, %v995_v20  ;;  %v448_v4 = vpop.f32.mrb[7].mxu0  ;;  %v512_v5 = vpop.f32.mrb[7].mxu1 }
  0xf5   : > { %v606_v6 = vadd.f32 %v1000_v22, %v567_v60  ;;  %v622_v7 = vadd.f32 %v1000_v22, %v583_v61  ;;  %v568_v8 = vmul.f32 %v995_v20, %v448_v4  ;;  %v584_v9 = vmul.f32 %v995_v20, %v512_v5 }
  0xf6   : > { %v640_v10 = vmax.f32 %v608_v0, 0.0  ;;  %v656_v11 = vmax.f32 %v624_v1, 0.0  ;;  %v609_v12 = vadd.f32 %v1000_v22, %v570_v2  ;;  %v625_v13 = vadd.f32 %v1000_v22, %v586_v3 }
  0xf7   : > { %v638_v14 = vmax.f32 %v606_v6, 0.0  ;;  %v654_v15 = vmax.f32 %v622_v7, 0.0  ;;  %v607_v16 = vadd.f32 %v1000_v22, %v568_v8  ;;  %v623_v17 = vadd.f32 %v1000_v22, %v584_v9 }
  0xf8   : > { %672 = vst [vmem:[%s1014_s11 + $0x30] sm:$0xff] %v640_v10  ;;  %688 = vst [vmem:[%s1014_s11 + $0xb0] sm:$0xff] %v656_v11  ;;  %v641_v18 = vmax.f32 %v609_v12, 0.0  ;;  %v657_v19 = vmax.f32 %v625_v13, 0.0 }
  0xf9   : > { %670 = vst [vmem:[%s1014_s11 + $0x20] sm:$0xff] %v638_v14  ;;  %686 = vst [vmem:[%s1014_s11 + $0xa0] sm:$0xff] %v654_v15  ;;  %v639_v21 = vmax.f32 %v607_v16, 0.0  ;;  %v655_v23 = vmax.f32 %v623_v17, 0.0  ;;  %v841_v24 = vpop.f32.mrb[8].mxu0  ;;  %v857_v25 = vpop.f32.mrb[8].mxu1 }
  0xfa   : > { %673 = vst [vmem:[%s1014_s11 + $0x38] sm:$0xff] %v641_v18  ;;  %689 = vst [vmem:[%s1014_s11 + $0xb8] sm:$0xff] %v657_v19  ;;  %v573_v26 = vmul.f32 %v841_v24, %v995_v20  ;;  %v589_v27 = vmul.f32 %v857_v25, %v995_v20  ;;  %v461_v28 = vpop.f32.mrb[9].mxu0  ;;  %v525_v29 = vpop.f32.mrb[9].mxu1 }
  0xfb   : > { %671 = vst [vmem:[%s1014_s11 + $0x28] sm:$0xff] %v639_v21  ;;  %687 = vst [vmem:[%s1014_s11 + $0xa8] sm:$0xff] %v655_v23  ;;  %v571_v30 = vmul.f32 %v995_v20, %v461_v28  ;;  %v587_v31 = vmul.f32 %v995_v20, %v525_v29  ;;  %v842_v32 = vpop.f32.mrb[10].mxu0  ;;  %v858_v33 = vpop.f32.mrb[10].mxu1 }
  0xfc   : > { %v612_v34 = vadd.f32 %v1000_v22, %v573_v26  ;;  %v628_v35 = vadd.f32 %v1000_v22, %v589_v27  ;;  %v574_v36 = vmul.f32 %v842_v32, %v995_v20  ;;  %v590_v37 = vmul.f32 %v858_v33, %v995_v20  ;;  %v464_v38 = vpop.f32.mrb[11].mxu0  ;;  %v528_v39 = vpop.f32.mrb[11].mxu1 }
  0xfd   : > { %v610_v40 = vadd.f32 %v1000_v22, %v571_v30  ;;  %v626_v41 = vadd.f32 %v1000_v22, %v587_v31  ;;  %v572_v42 = vmul.f32 %v995_v20, %v464_v38  ;;  %v588_v43 = vmul.f32 %v995_v20, %v528_v39 }
  0xfe   : > { %v644_v44 = vmax.f32 %v612_v34, 0.0  ;;  %v660_v45 = vmax.f32 %v628_v35, 0.0  ;;  %v613_v46 = vadd.f32 %v1000_v22, %v574_v36  ;;  %v629_v47 = vadd.f32 %v1000_v22, %v590_v37 }
  0xff   : > { %v642_v48 = vmax.f32 %v610_v40, 0.0  ;;  %v658_v49 = vmax.f32 %v626_v41, 0.0  ;;  %v611_v50 = vadd.f32 %v1000_v22, %v572_v42  ;;  %v627_v51 = vadd.f32 %v1000_v22, %v588_v43 }
 0x100   : > { %676 = vst [vmem:[%s1014_s11 + $0x50] sm:$0xff] %v644_v44  ;;  %692 = vst [vmem:[%s1014_s11 + $0xd0] sm:$0xff] %v660_v45  ;;  %v645_v52 = vmax.f32 %v613_v46, 0.0  ;;  %v661_v53 = vmax.f32 %v629_v47, 0.0 }
 0x101   : > { %674 = vst [vmem:[%s1014_s11 + $0x40] sm:$0xff] %v642_v48  ;;  %690 = vst [vmem:[%s1014_s11 + $0xc0] sm:$0xff] %v658_v49  ;;  %v643_v54 = vmax.f32 %v611_v50, 0.0  ;;  %v659_v55 = vmax.f32 %v627_v51, 0.0  ;;  %v845_v56 = vpop.f32.mrb[12].mxu0  ;;  %v861_v57 = vpop.f32.mrb[12].mxu1 }
 0x102   : > { %677 = vst [vmem:[%s1014_s11 + $0x58] sm:$0xff] %v645_v52  ;;  %693 = vst [vmem:[%s1014_s11 + $0xd8] sm:$0xff] %v661_v53  ;;  %v577_v58 = vmul.f32 %v845_v56, %v995_v20  ;;  %v593_v59 = vmul.f32 %v861_v57, %v995_v20  ;;  %v477_v60 = vpop.f32.mrb[13].mxu0  ;;  %v541_v61 = vpop.f32.mrb[13].mxu1 }
 0x103   : > { %675 = vst [vmem:[%s1014_s11 + $0x48] sm:$0xff] %v643_v54  ;;  %691 = vst [vmem:[%s1014_s11 + $0xc8] sm:$0xff] %v659_v55  ;;  %v575_v62 = vmul.f32 %v995_v20, %v477_v60  ;;  %v591_v63 = vmul.f32 %v995_v20, %v541_v61  ;;  %v846_v0 = vpop.f32.mrb[14].mxu0  ;;  %v862_v1 = vpop.f32.mrb[14].mxu1 }
 0x104   : > { %v616_v2 = vadd.f32 %v1000_v22, %v577_v58  ;;  %v632_v3 = vadd.f32 %v1000_v22, %v593_v59  ;;  %v578_v4 = vmul.f32 %v846_v0, %v995_v20  ;;  %v594_v5 = vmul.f32 %v862_v1, %v995_v20  ;;  %v480_v6 = vpop.f32.mrb[15].mxu0  ;;  %v544_v7 = vpop.f32.mrb[15].mxu1 }
 0x105   : > { %v614_v8 = vadd.f32 %v1000_v22, %v575_v62  ;;  %v630_v9 = vadd.f32 %v1000_v22, %v591_v63  ;;  %v576_v10 = vmul.f32 %v995_v20, %v480_v6  ;;  %v592_v11 = vmul.f32 %v995_v20, %v544_v7 }
 0x106   : > { %v648_v12 = vmax.f32 %v616_v2, 0.0  ;;  %v664_v13 = vmax.f32 %v632_v3, 0.0  ;;  %v617_v14 = vadd.f32 %v1000_v22, %v578_v4  ;;  %v633_v15 = vadd.f32 %v1000_v22, %v594_v5 }
 0x107   : > { %v646_v16 = vmax.f32 %v614_v8, 0.0  ;;  %v662_v17 = vmax.f32 %v630_v9, 0.0  ;;  %v615_v18 = vadd.f32 %v1000_v22, %v576_v10  ;;  %v631_v19 = vadd.f32 %v1000_v22, %v592_v11 }
 0x108   : > { %680 = vst [vmem:[%s1014_s11 + $0x70] sm:$0xff] %v648_v12  ;;  %696 = vst [vmem:[%s1014_s11 + $0xf0] sm:$0xff] %v664_v13  ;;  %v649_v21 = vmax.f32 %v617_v14, 0.0  ;;  %v665_v20 = vmax.f32 %v633_v15, 0.0 }
 0x109   : > { %678 = vst [vmem:[%s1014_s11 + $0x60] sm:$0xff] %v646_v16  ;;  %694 = vst [vmem:[%s1014_s11 + $0xe0] sm:$0xff] %v662_v17  ;;  %v647_v23 = vmax.f32 %v615_v18, 0.0  ;;  %v663_v24 = vmax.f32 %v631_v19, 0.0 }
 0x10a   : > { %681 = vst [vmem:[%s1014_s11 + $0x78] sm:$0xff] %v649_v21  ;;  %697 = vst [vmem:[%s1014_s11 + $0xf8] sm:$0xff] %v665_v20 }
 0x10b   : > { %679 = vst [vmem:[%s1014_s11 + $0x68] sm:$0xff] %v647_v23  ;;  %695 = vst [vmem:[%s1014_s11 + $0xe8] sm:$0xff] %v663_v24 }
 0x10c PF: > { %s14_s15 = sadd.s32 1, %s905_s15  }
 0x10d   : > { %p11_p4 = scmp.ge.s32.totalorder %s14_s15, 4  }
 0x10f   :  { %13 = sbr.rel (!%p11_p4) target bundleno = 1 (0x1), region = 66 }

</bundles_post_ra>
